<compile_context>
chip_gen: v7x
topology: tpu7x:2x2x1
jax: 0.10.0
libtpu: 0.0.40
codegen_flags: <defaults>
</compile_context>

<pallas_src>
import functools

import jax
import jax.numpy as jnp
from jax import lax
from jax.experimental import pallas as pl
from jax.experimental.pallas import tpu as pltpu

_EPS = 1e-5                      # nn.LayerNorm default eps
_CDT = jnp.bfloat16              # MXU compute dtype (accumulation stays f32)


# ---------------------------------------------------------------------------
# In-kernel helpers
# ---------------------------------------------------------------------------
def _mxu(a, b):
    """a @ b on the MXU, bf16 operands, f32 accumulation."""
    return jnp.dot(a.astype(_CDT), b.astype(_CDT), preferred_element_type=jnp.float32)


def _mxu_tn(a, b):
    """a^T @ b (contract leading axes) without materializing a transpose."""
    return lax.dot_general(a.astype(_CDT), b.astype(_CDT),
                           dimension_numbers=(((0,), (0,)), ((), ())),
                           preferred_element_type=jnp.float32)


def _layernorm(h, gamma, beta):
    mean = jnp.mean(h, axis=-1, keepdims=True)
    var = jnp.mean((h - mean) ** 2, axis=-1, keepdims=True)
    return (h - mean) * lax.rsqrt(var + _EPS) * gamma + beta


def _make_fused_kernel(num_layers):
    """Fused KnowledgeRepresentation forward for one batch element per grid step."""

    def kernel(adj_ref, x_ref, wp_ref, pp_ref, wg_ref, pg_ref, out_ref):
        cout = wg_ref.shape[-1]

        adj = adj_ref[0]                      # (n, n)       f32
        x = x_ref[0]                          # (n, Cin)     f32
        wp = wp_ref[...]                      # (Cin, 2C)    f32 (pre-transposed, repre||embed)
        pp = pp_ref[...]                      # (3, 2C)      rows: bias, gamma, beta

        # ---- Diffpool: two GCNs fused into one wide, reassociated matmul pair ----
        #   h = adj @ (x @ [Wr | We]) + [br | be]        (== (adj @ x) @ W^T + b)
        xw = _mxu(x, wp)                      # (n, 2C)
        h = _mxu(adj, xw) + pp[0:1, :]        # (n, 2C)
        h = jnp.maximum(h, 0.0)               # ReLU (dropout = identity)

        # LayerNorm is per-GCN (over each Cout half), not over the concatenated 2C.
        z = _layernorm(h[:, :cout], pp[1:2, :cout], pp[2:3, :cout])     # repre branch
        s = _layernorm(h[:, cout:], pp[1:2, cout:], pp[2:3, cout:])     # embed branch

        # softmax over the last dim (EUP reciprocal frees VALU slots)
        m = jnp.max(s, axis=-1, keepdims=True)
        e = jnp.exp(s - m)
        s = e * pl.reciprocal(jnp.sum(e, axis=-1, keepdims=True), approx=True)

        xp = _mxu_tn(s, z)                    # s^T z        -> (C, C)
        adjp = _mxu(_mxu_tn(s, adj), s)       # s^T adj s    -> (C, C)

        # ---- Residual GCN blocks (intermediates stay on-chip) ----
        for l in range(num_layers):           # static unroll; l is a compile-time index
            w = wg_ref[l]                     # (C, C) pre-transposed
            p = pg_ref[l]                     # (3, C) rows: bias, gamma, beta
            hh = _mxu(adjp, _mxu(xp, w)) + p[0:1, :]
            hh = jnp.maximum(hh, 0.0)
            xp = _layernorm(hh, p[1:2, :], p[2:3, :]) + xp

        # ---- Epilogue fused in: relu(x.sum(dim=-2)) ----
        out_ref[0] = jnp.maximum(jnp.sum(xp, axis=0, keepdims=True), 0.0)

    return kernel


# ---------------------------------------------------------------------------
# Wrapper: param packing + single pallas_call
# ---------------------------------------------------------------------------
def knowledge_representation(x, adj, params):
    """Full KnowledgeRepresentation.forward in one fused Pallas kernel."""
    B, n, cin = x.shape
    p_r, p_e = params["repre"], params["embed"]
    cout = p_r["w"].shape[0]
    layers = params["gcn_layers"]
    L = len(layers)

    # Pre-transpose + pack parameters (fewer, denser kernel inputs).
    w_pool = jnp.concatenate([p_r["w"].T, p_e["w"].T], axis=1).astype(jnp.float32)   # (Cin, 2C)
    p_pool = jnp.stack([
        jnp.concatenate([p_r["b"], p_e["b"]]),
        jnp.concatenate([p_r["gamma"], p_e["gamma"]]),
        jnp.concatenate([p_r["beta"], p_e["beta"]]),
    ]).astype(jnp.float32)                                                            # (3, 2C)

    if L > 0:
        w_gcn = jnp.stack([lp["w"].T for lp in layers]).astype(jnp.float32)           # (L, C, C)
        p_gcn = jnp.stack(
            [jnp.stack([lp["b"], lp["gamma"], lp["beta"]]) for lp in layers]
        ).astype(jnp.float32)                                                         # (L, 3, C)
    else:  # dummy (skipped by the static loop)
        w_gcn = jnp.zeros((1, cout, cout), jnp.float32)
        p_gcn = jnp.zeros((1, 3, cout), jnp.float32)

    kernel = _make_fused_kernel(L)

    out = pl.pallas_call(
        kernel,
        out_shape=jax.ShapeDtypeStruct((B, 1, cout), jnp.float32),
        grid=(B,),
        in_specs=[
            pl.BlockSpec((1, n, n), lambda b: (b, 0, 0)),        # adj   (per-batch)
            pl.BlockSpec((1, n, cin), lambda b: (b, 0, 0)),      # x     (per-batch)
            pl.BlockSpec(w_pool.shape, lambda b: (0, 0)),        # pooled conv weights
            pl.BlockSpec(p_pool.shape, lambda b: (0, 0)),        # pooled bias/gamma/beta
            pl.BlockSpec(w_gcn.shape, lambda b: (0, 0, 0)),      # stacked GCN weights
            pl.BlockSpec(p_gcn.shape, lambda b: (0, 0, 0)),      # stacked GCN bias/gamma/beta
        ],
        out_specs=pl.BlockSpec((1, 1, cout), lambda b: (b, 0, 0)),
        compiler_params=pltpu.CompilerParams(dimension_semantics=("parallel",)),
    )(adj, x, w_pool, p_pool, w_gcn, p_gcn)

    return out.reshape(B, cout)


# ---------------------------------------------------------------------------
# Deterministic parameter init (synthetic — matches module __init__ shapes)
# ---------------------------------------------------------------------------
def init_gcn_params(key, cin, cout):
    # InitializedConv1d(kernel_size=1): kaiming-style weight, zero bias; LayerNorm: ones/zeros.
    w = jax.random.normal(key, (cout, cin), jnp.float32) * jnp.sqrt(2.0 / cin)
    return {
        "w": w,
        "b": jnp.zeros((cout,), jnp.float32),
        "gamma": jnp.ones((cout,), jnp.float32),
        "beta": jnp.zeros((cout,), jnp.float32),
    }


if __name__ == "__main__":
    B, n_nodes, input_size, output_size, N = 2, 8, 32, 16, 3

    key = jax.random.PRNGKey(0)
    k_x, k_adj, k_p = jax.random.split(key, 3)

    x = jax.random.normal(k_x, (B, n_nodes, input_size), jnp.float32)
    adj = (jax.random.uniform(k_adj, (B, n_nodes, n_nodes)) > 0.5).astype(jnp.float32)
    adj = jnp.minimum(adj + jnp.transpose(adj, (0, 2, 1)) + jnp.eye(n_nodes)[None], 1.0)
    adj = adj / jnp.sum(adj, axis=-1, keepdims=True)   # row-normalized adjacency

    keys = jax.random.split(k_p, 2 + (N - 1))
    params = {
        "repre": init_gcn_params(keys[0], input_size, output_size),
        "embed": init_gcn_params(keys[1], input_size, output_size),
        "gcn_layers": [init_gcn_params(keys[2 + i], output_size, output_size)
                       for i in range(N - 1)],
    }

    out = knowledge_representation(x, adj, params)
    jax.block_until_ready(out)
    assert out.shape == (B, output_size)
    assert bool(jnp.all(jnp.isfinite(out)))
    print("KERNEL_OK")
</pallas_src>

<mosaic_0001>
module attributes {stable_mosaic.version = 11 : i64} {
  func.func @kernel(%arg0: i32, %arg1: memref<1x8x8xf32, #tpu.memory_space<vmem>>, %arg2: memref<1x8x32xf32, #tpu.memory_space<vmem>>, %arg3: memref<32x32xf32, #tpu.memory_space<vmem>>, %arg4: memref<3x32xf32, #tpu.memory_space<vmem>>, %arg5: memref<2x16x16xf32, #tpu.memory_space<vmem>>, %arg6: memref<2x3x16xf32, #tpu.memory_space<vmem>>, %arg7: memref<1x1x16xf32, #tpu.memory_space<vmem>>) attributes {dimension_semantics = [#tpu.dimension_semantics<parallel>], iteration_bounds = array<i64: 2>, scalar_prefetch = 0 : i64, scratch_operands = 0 : i64, tpu.core_type = #tpu.core_type<tc>, window_params = [{transform_indices = @transform_0, window_bounds = array<i64: 1, 8, 8>}, {transform_indices = @transform_1, window_bounds = array<i64: 1, 8, 32>}, {pipeline_mode = #tpu.pipeline_mode<synchronous>, transform_indices = @transform_2, window_bounds = array<i64: 32, 32>}, {pipeline_mode = #tpu.pipeline_mode<synchronous>, transform_indices = @transform_3, window_bounds = array<i64: 3, 32>}, {pipeline_mode = #tpu.pipeline_mode<synchronous>, transform_indices = @transform_4, window_bounds = array<i64: 2, 16, 16>}, {pipeline_mode = #tpu.pipeline_mode<synchronous>, transform_indices = @transform_5, window_bounds = array<i64: 2, 3, 16>}, {transform_indices = @transform_6, window_bounds = array<i64: 1, 1, 16>}]} {
    %c0 = arith.constant 0 : index
    %c0_0 = arith.constant 0 : index
    %c0_1 = arith.constant 0 : index
    %0 = vector.load %arg1[%c0, %c0_0, %c0_1] : memref<1x8x8xf32, #tpu.memory_space<vmem>>, vector<1x8x8xf32>
    %1 = vector.shape_cast %0 : vector<1x8x8xf32> to vector<8x8xf32>
    %c0_2 = arith.constant 0 : index
    %c0_3 = arith.constant 0 : index
    %c0_4 = arith.constant 0 : index
    %2 = vector.load %arg2[%c0_2, %c0_3, %c0_4] : memref<1x8x32xf32, #tpu.memory_space<vmem>>, vector<1x8x32xf32>
    %3 = vector.shape_cast %2 : vector<1x8x32xf32> to vector<8x32xf32>
    %c0_5 = arith.constant 0 : index
    %c0_6 = arith.constant 0 : index
    %4 = vector.load %arg3[%c0_5, %c0_6] : memref<32x32xf32, #tpu.memory_space<vmem>>, vector<32x32xf32>
    %c0_7 = arith.constant 0 : index
    %c0_8 = arith.constant 0 : index
    %5 = vector.load %arg4[%c0_7, %c0_8] : memref<3x32xf32, #tpu.memory_space<vmem>>, vector<3x32xf32>
    %6 = arith.truncf %3 : vector<8x32xf32> to vector<8x32xbf16>
    %7 = arith.truncf %4 : vector<32x32xf32> to vector<32x32xbf16>
    %cst = arith.constant dense<0.000000e+00> : vector<8x32xf32>
    %8 = tpu.matmul %6, %7, %cst {dimension_numbers = #tpu.dot_dimension_numbers<[1], [0], [0], [1], [0, 0, 1, 1], [], []>} : vector<8x32xbf16>, vector<32x32xbf16>, vector<8x32xf32> -> vector<8x32xf32>
    %9 = arith.truncf %1 : vector<8x8xf32> to vector<8x8xbf16>
    %10 = arith.truncf %8 : vector<8x32xf32> to vector<8x32xbf16>
    %cst_9 = arith.constant dense<0.000000e+00> : vector<8x32xf32>
    %11 = tpu.matmul %9, %10, %cst_9 {dimension_numbers = #tpu.dot_dimension_numbers<[1], [0], [0], [1], [0, 0, 1, 1], [], []>} : vector<8x8xbf16>, vector<8x32xbf16>, vector<8x32xf32> -> vector<8x32xf32>
    %12 = vector.extract_strided_slice %5 {offsets = [0, 0], sizes = [1, 32], strides = [1, 1]} : vector<3x32xf32> to vector<1x32xf32>
    %13 = vector.broadcast %12 : vector<1x32xf32> to vector<8x32xf32>
    %14 = arith.addf %11, %13 : vector<8x32xf32>
    %cst_10 = arith.constant 0.000000e+00 : f32
    %15 = vector.broadcast %cst_10 : f32 to vector<8x32xf32>
    %16 = arith.maximumf %14, %15 : vector<8x32xf32>
    %17 = vector.extract_strided_slice %16 {offsets = [0, 0], sizes = [8, 16], strides = [1, 1]} : vector<8x32xf32> to vector<8x16xf32>
    %18 = vector.extract_strided_slice %5 {offsets = [1, 0], sizes = [1, 16], strides = [1, 1]} : vector<3x32xf32> to vector<1x16xf32>
    %19 = vector.extract_strided_slice %5 {offsets = [2, 0], sizes = [1, 16], strides = [1, 1]} : vector<3x32xf32> to vector<1x16xf32>
    %cst_11 = arith.constant dense<0.000000e+00> : vector<8xf32>
    %20 = vector.multi_reduction <add>, %17, %cst_11 [1] : vector<8x16xf32> to vector<8xf32>
    %21 = vector.shape_cast %20 : vector<8xf32> to vector<8x1xf32>
    %cst_12 = arith.constant 1.600000e+01 : f32
    %22 = vector.broadcast %cst_12 : f32 to vector<8x1xf32>
    %23 = arith.divf %21, %22 : vector<8x1xf32>
    %24 = vector.broadcast %23 : vector<8x1xf32> to vector<8x16xf32>
    %25 = arith.subf %17, %24 : vector<8x16xf32>
    %26 = arith.mulf %25, %25 : vector<8x16xf32>
    %cst_13 = arith.constant dense<0.000000e+00> : vector<8xf32>
    %27 = vector.multi_reduction <add>, %26, %cst_13 [1] : vector<8x16xf32> to vector<8xf32>
    %28 = vector.shape_cast %27 : vector<8xf32> to vector<8x1xf32>
    %cst_14 = arith.constant 1.600000e+01 : f32
    %29 = vector.broadcast %cst_14 : f32 to vector<8x1xf32>
    %30 = arith.divf %28, %29 : vector<8x1xf32>
    %31 = vector.broadcast %23 : vector<8x1xf32> to vector<8x16xf32>
    %32 = arith.subf %17, %31 : vector<8x16xf32>
    %cst_15 = arith.constant 9.99999974E-6 : f32
    %33 = vector.broadcast %cst_15 : f32 to vector<8x1xf32>
    %34 = arith.addf %30, %33 : vector<8x1xf32>
    %35 = math.rsqrt %34 : vector<8x1xf32>
    %36 = vector.broadcast %35 : vector<8x1xf32> to vector<8x16xf32>
    %37 = arith.mulf %32, %36 : vector<8x16xf32>
    %38 = vector.broadcast %18 : vector<1x16xf32> to vector<8x16xf32>
    %39 = arith.mulf %37, %38 : vector<8x16xf32>
    %40 = vector.broadcast %19 : vector<1x16xf32> to vector<8x16xf32>
    %41 = arith.addf %39, %40 : vector<8x16xf32>
    %42 = vector.extract_strided_slice %16 {offsets = [0, 16], sizes = [8, 16], strides = [1, 1]} : vector<8x32xf32> to vector<8x16xf32>
    %43 = vector.extract_strided_slice %5 {offsets = [1, 16], sizes = [1, 16], strides = [1, 1]} : vector<3x32xf32> to vector<1x16xf32>
    %44 = vector.extract_strided_slice %5 {offsets = [2, 16], sizes = [1, 16], strides = [1, 1]} : vector<3x32xf32> to vector<1x16xf32>
    %cst_16 = arith.constant dense<0.000000e+00> : vector<8xf32>
    %45 = vector.multi_reduction <add>, %42, %cst_16 [1] : vector<8x16xf32> to vector<8xf32>
    %46 = vector.shape_cast %45 : vector<8xf32> to vector<8x1xf32>
    %cst_17 = arith.constant 1.600000e+01 : f32
    %47 = vector.broadcast %cst_17 : f32 to vector<8x1xf32>
    %48 = arith.divf %46, %47 : vector<8x1xf32>
    %49 = vector.broadcast %48 : vector<8x1xf32> to vector<8x16xf32>
    %50 = arith.subf %42, %49 : vector<8x16xf32>
    %51 = arith.mulf %50, %50 : vector<8x16xf32>
    %cst_18 = arith.constant dense<0.000000e+00> : vector<8xf32>
    %52 = vector.multi_reduction <add>, %51, %cst_18 [1] : vector<8x16xf32> to vector<8xf32>
    %53 = vector.shape_cast %52 : vector<8xf32> to vector<8x1xf32>
    %cst_19 = arith.constant 1.600000e+01 : f32
    %54 = vector.broadcast %cst_19 : f32 to vector<8x1xf32>
    %55 = arith.divf %53, %54 : vector<8x1xf32>
    %56 = vector.broadcast %48 : vector<8x1xf32> to vector<8x16xf32>
    %57 = arith.subf %42, %56 : vector<8x16xf32>
    %cst_20 = arith.constant 9.99999974E-6 : f32
    %58 = vector.broadcast %cst_20 : f32 to vector<8x1xf32>
    %59 = arith.addf %55, %58 : vector<8x1xf32>
    %60 = math.rsqrt %59 : vector<8x1xf32>
    %61 = vector.broadcast %60 : vector<8x1xf32> to vector<8x16xf32>
    %62 = arith.mulf %57, %61 : vector<8x16xf32>
    %63 = vector.broadcast %43 : vector<1x16xf32> to vector<8x16xf32>
    %64 = arith.mulf %62, %63 : vector<8x16xf32>
    %65 = vector.broadcast %44 : vector<1x16xf32> to vector<8x16xf32>
    %66 = arith.addf %64, %65 : vector<8x16xf32>
    %cst_21 = arith.constant dense<0xFF800000> : vector<8xf32>
    %67 = vector.multi_reduction <maximumf>, %66, %cst_21 [1] : vector<8x16xf32> to vector<8xf32>
    %68 = vector.shape_cast %67 : vector<8xf32> to vector<8x1xf32>
    %69 = vector.broadcast %68 : vector<8x1xf32> to vector<8x16xf32>
    %70 = arith.subf %66, %69 : vector<8x16xf32>
    %71 = math.exp %70 : vector<8x16xf32>
    %cst_22 = arith.constant dense<0.000000e+00> : vector<8xf32>
    %72 = vector.multi_reduction <add>, %71, %cst_22 [1] : vector<8x16xf32> to vector<8xf32>
    %73 = vector.shape_cast %72 : vector<8xf32> to vector<8x1xf32>
    %74 = tpu.reciprocal %73 {approx = true} : vector<8x1xf32> -> vector<8x1xf32>
    %75 = vector.broadcast %74 : vector<8x1xf32> to vector<8x16xf32>
    %76 = arith.mulf %71, %75 : vector<8x16xf32>
    %77 = arith.truncf %76 : vector<8x16xf32> to vector<8x16xbf16>
    %78 = arith.truncf %41 : vector<8x16xf32> to vector<8x16xbf16>
    %cst_23 = arith.constant dense<0.000000e+00> : vector<16x16xf32>
    %79 = tpu.matmul %77, %78, %cst_23 {dimension_numbers = #tpu.dot_dimension_numbers<[0], [0], [1], [1], [0, 1, 1, 1], [], []>} : vector<8x16xbf16>, vector<8x16xbf16>, vector<16x16xf32> -> vector<16x16xf32>
    %80 = arith.truncf %76 : vector<8x16xf32> to vector<8x16xbf16>
    %81 = arith.truncf %1 : vector<8x8xf32> to vector<8x8xbf16>
    %cst_24 = arith.constant dense<0.000000e+00> : vector<16x8xf32>
    %82 = tpu.matmul %80, %81, %cst_24 {dimension_numbers = #tpu.dot_dimension_numbers<[0], [0], [1], [1], [0, 1, 1, 1], [], []>} : vector<8x16xbf16>, vector<8x8xbf16>, vector<16x8xf32> -> vector<16x8xf32>
    %83 = arith.truncf %82 : vector<16x8xf32> to vector<16x8xbf16>
    %84 = arith.truncf %76 : vector<8x16xf32> to vector<8x16xbf16>
    %cst_25 = arith.constant dense<0.000000e+00> : vector<16x16xf32>
    %85 = tpu.matmul %83, %84, %cst_25 {dimension_numbers = #tpu.dot_dimension_numbers<[1], [0], [0], [1], [0, 0, 1, 1], [], []>} : vector<16x8xbf16>, vector<8x16xbf16>, vector<16x16xf32> -> vector<16x16xf32>
    %c0_26 = arith.constant 0 : index
    %c0_27 = arith.constant 0 : index
    %c0_28 = arith.constant 0 : index
    %86 = vector.load %arg5[%c0_26, %c0_27, %c0_28] : memref<2x16x16xf32, #tpu.memory_space<vmem>>, vector<1x16x16xf32>
    %87 = vector.shape_cast %86 : vector<1x16x16xf32> to vector<16x16xf32>
    %c0_29 = arith.constant 0 : index
    %c0_30 = arith.constant 0 : index
    %c0_31 = arith.constant 0 : index
    %88 = vector.load %arg6[%c0_29, %c0_30, %c0_31] : memref<2x3x16xf32, #tpu.memory_space<vmem>>, vector<1x3x16xf32>
    %89 = vector.shape_cast %88 : vector<1x3x16xf32> to vector<3x16xf32>
    %90 = arith.truncf %79 : vector<16x16xf32> to vector<16x16xbf16>
    %91 = arith.truncf %87 : vector<16x16xf32> to vector<16x16xbf16>
    %cst_32 = arith.constant dense<0.000000e+00> : vector<16x16xf32>
    %92 = tpu.matmul %90, %91, %cst_32 {dimension_numbers = #tpu.dot_dimension_numbers<[1], [0], [0], [1], [0, 0, 1, 1], [], []>} : vector<16x16xbf16>, vector<16x16xbf16>, vector<16x16xf32> -> vector<16x16xf32>
    %93 = arith.truncf %85 : vector<16x16xf32> to vector<16x16xbf16>
    %94 = arith.truncf %92 : vector<16x16xf32> to vector<16x16xbf16>
    %cst_33 = arith.constant dense<0.000000e+00> : vector<16x16xf32>
    %95 = tpu.matmul %93, %94, %cst_33 {dimension_numbers = #tpu.dot_dimension_numbers<[1], [0], [0], [1], [0, 0, 1, 1], [], []>} : vector<16x16xbf16>, vector<16x16xbf16>, vector<16x16xf32> -> vector<16x16xf32>
    %96 = vector.extract_strided_slice %89 {offsets = [0, 0], sizes = [1, 16], strides = [1, 1]} : vector<3x16xf32> to vector<1x16xf32>
    %97 = vector.broadcast %96 : vector<1x16xf32> to vector<16x16xf32>
    %98 = arith.addf %95, %97 : vector<16x16xf32>
    %cst_34 = arith.constant 0.000000e+00 : f32
    %99 = vector.broadcast %cst_34 : f32 to vector<16x16xf32>
    %100 = arith.maximumf %98, %99 : vector<16x16xf32>
    %101 = vector.extract_strided_slice %89 {offsets = [1, 0], sizes = [1, 16], strides = [1, 1]} : vector<3x16xf32> to vector<1x16xf32>
    %102 = vector.extract_strided_slice %89 {offsets = [2, 0], sizes = [1, 16], strides = [1, 1]} : vector<3x16xf32> to vector<1x16xf32>
    %cst_35 = arith.constant dense<0.000000e+00> : vector<16xf32>
    %103 = vector.multi_reduction <add>, %100, %cst_35 [1] : vector<16x16xf32> to vector<16xf32>
    %104 = vector.shape_cast %103 : vector<16xf32> to vector<16x1xf32>
    %cst_36 = arith.constant 1.600000e+01 : f32
    %105 = vector.broadcast %cst_36 : f32 to vector<16x1xf32>
    %106 = arith.divf %104, %105 : vector<16x1xf32>
    %107 = vector.broadcast %106 : vector<16x1xf32> to vector<16x16xf32>
    %108 = arith.subf %100, %107 : vector<16x16xf32>
    %109 = arith.mulf %108, %108 : vector<16x16xf32>
    %cst_37 = arith.constant dense<0.000000e+00> : vector<16xf32>
    %110 = vector.multi_reduction <add>, %109, %cst_37 [1] : vector<16x16xf32> to vector<16xf32>
    %111 = vector.shape_cast %110 : vector<16xf32> to vector<16x1xf32>
    %cst_38 = arith.constant 1.600000e+01 : f32
    %112 = vector.broadcast %cst_38 : f32 to vector<16x1xf32>
    %113 = arith.divf %111, %112 : vector<16x1xf32>
    %114 = vector.broadcast %106 : vector<16x1xf32> to vector<16x16xf32>
    %115 = arith.subf %100, %114 : vector<16x16xf32>
    %cst_39 = arith.constant 9.99999974E-6 : f32
    %116 = vector.broadcast %cst_39 : f32 to vector<16x1xf32>
    %117 = arith.addf %113, %116 : vector<16x1xf32>
    %118 = math.rsqrt %117 : vector<16x1xf32>
    %119 = vector.broadcast %118 : vector<16x1xf32> to vector<16x16xf32>
    %120 = arith.mulf %115, %119 : vector<16x16xf32>
    %121 = vector.broadcast %101 : vector<1x16xf32> to vector<16x16xf32>
    %122 = arith.mulf %120, %121 : vector<16x16xf32>
    %123 = vector.broadcast %102 : vector<1x16xf32> to vector<16x16xf32>
    %124 = arith.addf %122, %123 : vector<16x16xf32>
    %125 = arith.addf %124, %79 : vector<16x16xf32>
    %c1 = arith.constant 1 : index
    %c0_40 = arith.constant 0 : index
    %c0_41 = arith.constant 0 : index
    %126 = vector.load %arg5[%c1, %c0_40, %c0_41] : memref<2x16x16xf32, #tpu.memory_space<vmem>>, vector<1x16x16xf32>
    %127 = vector.shape_cast %126 : vector<1x16x16xf32> to vector<16x16xf32>
    %c1_42 = arith.constant 1 : index
    %c0_43 = arith.constant 0 : index
    %c0_44 = arith.constant 0 : index
    %128 = vector.load %arg6[%c1_42, %c0_43, %c0_44] : memref<2x3x16xf32, #tpu.memory_space<vmem>>, vector<1x3x16xf32>
    %129 = vector.shape_cast %128 : vector<1x3x16xf32> to vector<3x16xf32>
    %130 = arith.truncf %125 : vector<16x16xf32> to vector<16x16xbf16>
    %131 = arith.truncf %127 : vector<16x16xf32> to vector<16x16xbf16>
    %cst_45 = arith.constant dense<0.000000e+00> : vector<16x16xf32>
    %132 = tpu.matmul %130, %131, %cst_45 {dimension_numbers = #tpu.dot_dimension_numbers<[1], [0], [0], [1], [0, 0, 1, 1], [], []>} : vector<16x16xbf16>, vector<16x16xbf16>, vector<16x16xf32> -> vector<16x16xf32>
    %133 = arith.truncf %85 : vector<16x16xf32> to vector<16x16xbf16>
    %134 = arith.truncf %132 : vector<16x16xf32> to vector<16x16xbf16>
    %cst_46 = arith.constant dense<0.000000e+00> : vector<16x16xf32>
    %135 = tpu.matmul %133, %134, %cst_46 {dimension_numbers = #tpu.dot_dimension_numbers<[1], [0], [0], [1], [0, 0, 1, 1], [], []>} : vector<16x16xbf16>, vector<16x16xbf16>, vector<16x16xf32> -> vector<16x16xf32>
    %136 = vector.extract_strided_slice %129 {offsets = [0, 0], sizes = [1, 16], strides = [1, 1]} : vector<3x16xf32> to vector<1x16xf32>
    %137 = vector.broadcast %136 : vector<1x16xf32> to vector<16x16xf32>
    %138 = arith.addf %135, %137 : vector<16x16xf32>
    %cst_47 = arith.constant 0.000000e+00 : f32
    %139 = vector.broadcast %cst_47 : f32 to vector<16x16xf32>
    %140 = arith.maximumf %138, %139 : vector<16x16xf32>
    %141 = vector.extract_strided_slice %129 {offsets = [1, 0], sizes = [1, 16], strides = [1, 1]} : vector<3x16xf32> to vector<1x16xf32>
    %142 = vector.extract_strided_slice %129 {offsets = [2, 0], sizes = [1, 16], strides = [1, 1]} : vector<3x16xf32> to vector<1x16xf32>
    %cst_48 = arith.constant dense<0.000000e+00> : vector<16xf32>
    %143 = vector.multi_reduction <add>, %140, %cst_48 [1] : vector<16x16xf32> to vector<16xf32>
    %144 = vector.shape_cast %143 : vector<16xf32> to vector<16x1xf32>
    %cst_49 = arith.constant 1.600000e+01 : f32
    %145 = vector.broadcast %cst_49 : f32 to vector<16x1xf32>
    %146 = arith.divf %144, %145 : vector<16x1xf32>
    %147 = vector.broadcast %146 : vector<16x1xf32> to vector<16x16xf32>
    %148 = arith.subf %140, %147 : vector<16x16xf32>
    %149 = arith.mulf %148, %148 : vector<16x16xf32>
    %cst_50 = arith.constant dense<0.000000e+00> : vector<16xf32>
    %150 = vector.multi_reduction <add>, %149, %cst_50 [1] : vector<16x16xf32> to vector<16xf32>
    %151 = vector.shape_cast %150 : vector<16xf32> to vector<16x1xf32>
    %cst_51 = arith.constant 1.600000e+01 : f32
    %152 = vector.broadcast %cst_51 : f32 to vector<16x1xf32>
    %153 = arith.divf %151, %152 : vector<16x1xf32>
    %154 = vector.broadcast %146 : vector<16x1xf32> to vector<16x16xf32>
    %155 = arith.subf %140, %154 : vector<16x16xf32>
    %cst_52 = arith.constant 9.99999974E-6 : f32
    %156 = vector.broadcast %cst_52 : f32 to vector<16x1xf32>
    %157 = arith.addf %153, %156 : vector<16x1xf32>
    %158 = math.rsqrt %157 : vector<16x1xf32>
    %159 = vector.broadcast %158 : vector<16x1xf32> to vector<16x16xf32>
    %160 = arith.mulf %155, %159 : vector<16x16xf32>
    %161 = vector.broadcast %141 : vector<1x16xf32> to vector<16x16xf32>
    %162 = arith.mulf %160, %161 : vector<16x16xf32>
    %163 = vector.broadcast %142 : vector<1x16xf32> to vector<16x16xf32>
    %164 = arith.addf %162, %163 : vector<16x16xf32>
    %165 = arith.addf %164, %125 : vector<16x16xf32>
    %cst_53 = arith.constant dense<0.000000e+00> : vector<16xf32>
    %166 = vector.multi_reduction <add>, %165, %cst_53 [0] : vector<16x16xf32> to vector<16xf32>
    %167 = vector.shape_cast %166 : vector<16xf32> to vector<1x16xf32>
    %cst_54 = arith.constant 0.000000e+00 : f32
    %168 = vector.broadcast %cst_54 : f32 to vector<1x16xf32>
    %169 = arith.maximumf %167, %168 : vector<1x16xf32>
    %c0_55 = arith.constant 0 : index
    %c0_56 = arith.constant 0 : index
    %c0_57 = arith.constant 0 : index
    %170 = vector.load %arg7[%c0_55, %c0_56, %c0_57] : memref<1x1x16xf32, #tpu.memory_space<vmem>>, vector<1x1x16xf32>
    %171 = vector.shape_cast %170 : vector<1x1x16xf32> to vector<1x16xf32>
    %172 = vector.shape_cast %169 : vector<1x16xf32> to vector<1x1x16xf32>
    tpu.vector_store %arg7[%c0_55, %c0_56, %c0_57], %172 {strides = array<i32>} : memref<1x1x16xf32, #tpu.memory_space<vmem>>, vector<1x1x16xf32>,
    return
  }
  func.func @transform_0(%arg0: i32) -> (i32, i32, i32) {
    %c0_i32 = arith.constant 0 : i32
    %c0_i32_0 = arith.constant 0 : i32
    %c0_i32_1 = arith.constant 0 : i32
    return %arg0, %c0_i32, %c0_i32_0 : i32, i32, i32
  }
  func.func @transform_1(%arg0: i32) -> (i32, i32, i32) {
    %c0_i32 = arith.constant 0 : i32
    %c0_i32_0 = arith.constant 0 : i32
    %c0_i32_1 = arith.constant 0 : i32
    return %arg0, %c0_i32, %c0_i32_0 : i32, i32, i32
  }
  func.func @transform_2(%arg0: i32) -> (i32, i32) {
    %c0_i32 = arith.constant 0 : i32
    %c0_i32_0 = arith.constant 0 : i32
    %c0_i32_1 = arith.constant 0 : i32
    return %c0_i32, %c0_i32_0 : i32, i32
  }
  func.func @transform_3(%arg0: i32) -> (i32, i32) {
    %c0_i32 = arith.constant 0 : i32
    %c0_i32_0 = arith.constant 0 : i32
    %c0_i32_1 = arith.constant 0 : i32
    return %c0_i32, %c0_i32_0 : i32, i32
  }
  func.func @transform_4(%arg0: i32) -> (i32, i32, i32) {
    %c0_i32 = arith.constant 0 : i32
    %c0_i32_0 = arith.constant 0 : i32
    %c0_i32_1 = arith.constant 0 : i32
    %c0_i32_2 = arith.constant 0 : i32
    return %c0_i32, %c0_i32_0, %c0_i32_1 : i32, i32, i32
  }
  func.func @transform_5(%arg0: i32) -> (i32, i32, i32) {
    %c0_i32 = arith.constant 0 : i32
    %c0_i32_0 = arith.constant 0 : i32
    %c0_i32_1 = arith.constant 0 : i32
    %c0_i32_2 = arith.constant 0 : i32
    return %c0_i32, %c0_i32_0, %c0_i32_1 : i32, i32, i32
  }
  func.func @transform_6(%arg0: i32) -> (i32, i32, i32) {
    %c0_i32 = arith.constant 0 : i32
    %c0_i32_0 = arith.constant 0 : i32
    %c0_i32_1 = arith.constant 0 : i32
    return %arg0, %c0_i32, %c0_i32_0 : i32, i32, i32
  }
}

</mosaic_0001>

<bundles_post_ra>
// kernel: tpu_custom_call.1
= control target key start
LH: loop header
LB: loop body
LE: loop exit
PB: predicated region body
PF: predicated region fallthrough
CT: control target
= control target key end

     0   :  { %11 = vsyncpa [#allocation3], 0  ;;  %s1872_s0 = inlined_call_operand.hbm [shape: f32[2,8,8], index: 0, kind: input, shape index: {}]   ;;  %s1873_s1 = inlined_call_operand.vmem [shape: f32[2,8,32], index: 1, kind: input, shape index: {}]   ;;  %s1874_s2 = inlined_call_operand.hbm [shape: f32[32,32], index: 2, kind: input, shape index: {}]   ;;  %s1875_s3 = inlined_call_operand.hbm [shape: f32[3,32], index: 3, kind: input, shape index: {}]   ;;  %s1876_s4 = inlined_call_operand.hbm [shape: f32[2,16,16], index: 4, kind: input, shape index: {}]   ;;  %s1877_s5 = inlined_call_operand.vmem [shape: f32[2,3,16], index: 5, kind: input, shape index: {}]   ;;  %s1878_s6 = inlined_call_operand.hbm [shape: f32[2,1,16], index: 6, kind: output, shape index: {}]  }
   0x1   :  { %13 = vsyncpa [#allocation3 + $0x1], 0 }
   0x2   :  { %14 = vsyncpa [#allocation6], 0 }
   0x3   :  { %15 = vsyncpa [#allocation9], 0 }
   0x4   :  { %16 = vsyncpa [#allocation4], 0 }
   0x5   :  { %18 = vsyncpa [#allocation4 + $0x1], 0  ;;  %s1507_s21 = smov 0   ;;  %s1509_s22 = smov 0  }
   0x6   :  { %s1511_s23 = smov 0   ;;  %s1513_s24 = smov 0  }
   0x7 LB: > { %s1528_s25 = sadd.s32 4294967295, %s1460_s24   ;;  %s1071_s26 = sadd.s32 4294967294, %s1460_s24   ;;  %s1460_s24 = sphi %s1513_s24, %s1901_s24   ;;  %s1456_s23 = sphi %s1511_s23, %s1900_s23   ;;  %s1452_s22 = sphi %s1509_s22, %s1899_s22   ;;  %s1448_s21 = sphi %s1507_s21, %s1898_s21  }
   0x8   : > { %p44_p0 = scmp.ne.s32.totalorder %s1452_s22, %s1448_s21  ;;  %p1879_p1 = scmp.eq.s32.totalorder %s1528_s25, 0 }
   0x9   : > { %p184_p3 = scmp.eq.s32.totalorder %s1071_s26, 1  ;;  %p1072_p5 = scmp.ge.s32.totalorder %s1460_s24, 1 }
   0xa   : > { %p1537_p4 = por %p1879_p1, %p44_p0  ;;  %p191_p7 = scmp.lt.s32.totalorder %s1460_s24, 3 }
   0xb   : > { %p1542_p6 = por %p184_p3, %p44_p0  ;;  %s1462_s30 = smov [#allocation5]  }
   0xc   : > { %s1882_s27 = scalar_select %p1537_p4, 1, 0 }
   0xd   : > { %s1883_s28 = scalar_select %p1542_p6, 1, 0 }
   0xe   : > { %p1547_p8 = pnand %p1072_p5, %p191_p7  ;;  %s203_s7 = sshll.u32 %s1462_s30, 4  ;;  %s1551_s7 = int_to_ptr.vmem [resolvable:$true] %s203_s7 }
   0xf   : > { %s1463_s9 = smov [#allocation7]   ;;  %s1464_s11 = smov [#allocation8]  }
  0x10   : > { %s1884_s29 = scalar_select %p1547_p8, 1, 0 }
  0x11   : > { %p1189_p9 = pneg %p1547_p8  ;;  %s217_s10 = sshll.u32 %s1463_s9, 4  ;;  %s1562_s10 = int_to_ptr.vmem [resolvable:$true] %s217_s10 }
  0x12   : > { %s1564_s12 = sshll.u32 %s1464_s11, 4  ;;  %s1272_s15 = scalar_lea.hbm %s1874_s2, 512  ;;  %s228_s12 = int_to_ptr.vmem [resolvable:$true] %s1564_s12 }
  0x13   : > { %p1558_p11 = pnand %p1189_p9, %p1879_p1  ;;  %p1273_p12 = scmp.ne.s32.totalorder %s1874_s2, %s1272_s15 }
  0x14   : > { %p1279_p5 = scmp.lt.u32.totalorder %s1272_s15, %s1874_s2 }
  0x15   : > { %p1574_p13 = pneg %p1558_p11 }
  0x17   : > { %p1275_p0 = pnand %p1574_p13, %p1273_p12 }
  0x19   : > { %p1276_p3 = pneg %p1275_p0 }
  0x1b   : > { %p1281_p7 = pnand %p1279_p5, %p1276_p3 }
  0x1d   : > { %1284 = shalt.err (!%p1281_p7)
}
  0x1e   : > { %s1285_s26 = scalar_lea.vmem %s1551_s7, 512  ;;  %p1293_p2 = scmp.lt.s32.totalorder %s1551_s7, %s1551_s7 }
  0x1f   : > { %p1286_p9 = scmp.ne.s32.totalorder %s1551_s7, %s1285_s26  ;;  %p1294_p6 = scmp.lt.s32.totalorder %s1285_s26, %s1285_s26 }
  0x21   : > { %p1288_p10 = pnand %p1286_p9, %p1574_p13  ;;  %p1295_p12 = por %p1294_p6, %p1293_p2 }
  0x23   : > { %p1289_p1 = pneg %p1288_p10 }
  0x25   : > { %p1296_p0 = pnand %p1295_p12, %p1289_p1 }
  0x27   : > { %1299 = shalt.err (!%p1296_p0)
}
  0x28   : > { %s1465_s30 = smov 128   ;;  %s1466_s9 = smov 8  }
  0x29   : > { %1192 = dma.hbm_to_vmem [thread:$0]  (!%p1558_p11), %s1874_s2, 512, %s1551_s7, [#allocation6], %s1465_s30, %s1465_s30, %s1466_s9  }
  0x2a   : > { %s1300_s16 = scalar_lea.hbm %s1875_s3, 64 }
  0x2b   : > { %p1301_p1 = scmp.ne.s32.totalorder %s1875_s3, %s1300_s16  ;;  %p1307_p10 = scmp.lt.u32.totalorder %s1300_s16, %s1875_s3 }
  0x2d   : > { %p1303_p2 = pnand %p1301_p1, %p1574_p13 }
  0x2f   : > { %p1304_p6 = pneg %p1303_p2 }
  0x31   : > { %p1309_p3 = pnand %p1307_p10, %p1304_p6 }
  0x33   : > { %1312 = shalt.err (!%p1309_p3)
}
  0x34   : > { %s1313_s7 = scalar_lea.vmem %s1562_s10, 64  ;;  %p1321_p12 = scmp.lt.s32.totalorder %s1562_s10, %s1562_s10 }
  0x35   : > { %p1314_p5 = scmp.ne.s32.totalorder %s1562_s10, %s1313_s7  ;;  %p1322_p0 = scmp.lt.s32.totalorder %s1313_s7, %s1313_s7 }
  0x37   : > { %p1316_p7 = pnand %p1314_p5, %p1574_p13  ;;  %p1323_p1 = por %p1322_p0, %p1321_p12 }
  0x39   : > { %p1317_p9 = pneg %p1316_p7 }
  0x3b   : > { %p1324_p2 = pnand %p1323_p1, %p1317_p9 }
  0x3d   : > { %1327 = shalt.err (!%p1324_p2)
}
  0x3e   : > { %1195 = dma.hbm_to_vmem [thread:$0]  (!%p1558_p11), %s1875_s3, 64, %s1562_s10, [#allocation6]  }
  0x3f   : > { %s1328_s16 = scalar_lea.hbm %s1876_s4, 512 }
  0x40   : > { %p1329_p6 = scmp.ne.s32.totalorder %s1876_s4, %s1328_s16  ;;  %p1335_p5 = scmp.lt.u32.totalorder %s1328_s16, %s1876_s4 }
  0x42   : > { %p1331_p10 = pnand %p1329_p6, %p1574_p13 }
  0x44   : > { %p1332_p3 = pneg %p1331_p10 }
  0x46   : > { %p1337_p7 = pnand %p1335_p5, %p1332_p3 }
  0x48   : > { %1340 = shalt.err (!%p1337_p7)
}
  0x49   : > { %s1341_s7 = scalar_lea.vmem %s228_s12, 512  ;;  %p1349_p1 = scmp.lt.s32.totalorder %s228_s12, %s228_s12 }
  0x4a   : > { %p1342_p9 = scmp.ne.s32.totalorder %s228_s12, %s1341_s7  ;;  %p1350_p2 = scmp.lt.s32.totalorder %s1341_s7, %s1341_s7 }
  0x4c   : > { %p1344_p12 = pnand %p1342_p9, %p1574_p13  ;;  %p1351_p4 = por %p1350_p2, %p1349_p1 }
  0x4e   : > { %p1345_p0 = pneg %p1344_p12 }
  0x50   : > { %p1352_p8 = pnand %p1351_p4, %p1345_p0 }
  0x52   : > { %1355 = shalt.err (!%p1352_p8)
}
  0x53   : > { %1198 = dma.hbm_to_vmem [thread:$0]  (!%p1558_p11), %s1876_s4, 512, %s228_s12, [#allocation9], %s1465_s30, %s1465_s30, %s1466_s9  }
  0x54   : > { %s1644_s18 = sadd.s32 1, %s1460_s24   ;;  %s31_s13 = sadd.s32 1, %s1456_s23 }
  0x55   : > { %s28_s8 = ssub.s32 %s1460_s24, %s1644_s18  ;;  %p38_p8 = scmp.ne.s32.totalorder %s1456_s23, %s1452_s22 }
  0x56   : > { %p29_p4 = scmp.eq.s32.totalorder %s28_s8, 0  ;;  %p39_p13 = scmp.eq.s32.totalorder %s1460_s24, 0 }
  0x57   : > { %p1210_p6 = scmp.lt.s32.totalorder %s1460_s24, 2  ;;  %p1887_p3 = scmp.eq.s32.totalorder %s1528_s25, 1 }
  0x58   : > { %s1654_s14 = scalar_select %p29_p4, %s1456_s23, %s31_s13  }
  0x59   : > { %p40_p10 = por %p39_p13, %p38_p8  ;;  %p1658_p5 = por %p1887_p3, %p38_p8 }
  0x5a   : > { %s244_s16 = sand.u32 1, %s1456_s23   ;;  %s1078_s17 = sshll.u32 %s1460_s24, 7 }
  0x5b   : > { %s1077_s12 = sshll.u32 %s244_s16, 3  ;;  %s1667_s19 = scalar_lea.hbm %s1872_s0, %s1078_s17 }
  0x5c   : > { %s248_s20 = scalar_lea.vmem [#allocation2], %s1077_s12  ;;  %p1669_p11 = pnand %p1210_p6, %p40_p10 }
  0x5d   : > { %s255_s26 = sshll.u32 %s248_s20, 4  ;;  %s245_s10 = scalar_lea.sflag [#allocation3], %s244_s16  ;;  %s1673_s26 = int_to_ptr.vmem [resolvable:$true] %s255_s26 }
  0x5e   : > { %s1356_s11 = scalar_lea.hbm %s1667_s19, 128  ;;  %p1358_p9 = pneg %p1669_p11 }
  0x5f   : > { %p1357_p7 = scmp.ne.s32.totalorder %s1667_s19, %s1356_s11  ;;  %s1361_s17 = scalar_lea.hbm %s1872_s0, 256 }
  0x60   : > { %p1362_p1 = scmp.lt.u32.totalorder %s1667_s19, %s1872_s0  ;;  %p1363_p2 = scmp.lt.u32.totalorder %s1361_s17, %s1356_s11 }
  0x61   : > { %p1359_p12 = pnand %p1358_p9, %p1357_p7  ;;  %p1365_p8 = scmp.lt.u32.totalorder %s1356_s11, %s1667_s19 }
  0x62   : > { %p1364_p4 = por %p1363_p2, %p1362_p1 }
  0x63   : > { %p1360_p0 = pneg %p1359_p12 }
  0x64   : > { %p1366_p13 = por %p1365_p8, %p1364_p4 }
  0x66   : > { %p1367_p6 = pnand %p1366_p13, %p1360_p0 }
  0x68   : > { %1370 = shalt.err (!%p1367_p6)
}
  0x69   : > { %s1371_s16 = scalar_lea.vmem %s1673_s26, 128  ;;  %s1467_s9 = smov [#allocation2]  }
  0x6a   : > { %p1372_p10 = scmp.ne.s32.totalorder %s1673_s26, %s1371_s16  ;;  %s1376_s20 = sshll.u32 %s1467_s9, 4  ;;  %s1377_s20 = int_to_ptr.vmem [resolvable:$false] %s1376_s20 }
  0x6b   : > { %s1378_s8 = scalar_lea.vmem %s1377_s20, 256  ;;  %p1379_p12 = scmp.lt.s32.totalorder %s1673_s26, %s1377_s20 }
  0x6c   : > { %p1374_p3 = pnand %p1372_p10, %p1358_p9  ;;  %p1380_p1 = scmp.lt.s32.totalorder %s1378_s8, %s1371_s16 }
  0x6e   : > { %p1375_p7 = pneg %p1374_p3  ;;  %p1381_p2 = por %p1380_p1, %p1379_p12 }
  0x70   : > { %p1382_p4 = pnand %p1381_p2, %p1375_p7 }
  0x72   : > { %1385 = shalt.err (!%p1382_p4)
}
  0x73   : > { %1202 = dma.hbm_to_vmem [thread:$0]  (!%p1669_p11), %s1667_s19, 128, %s1673_s26, %s245_s10  }
  0x74   : > { %p1890_p0 = scmp.ne.s32.totalorder %s1884_s29, 0 }
  0x75   : > { %s1703_s11 = sand.u32 (!%p1890_p0), 1, %s1452_s22   ;;  %p1891_p9 = scmp.ne.s32.totalorder (!%p1890_p0), %s1882_s27, 0 }
  0x76   : > { %271 = sbr.rel (%p1890_p0) target bundleno = 3550 (0xdde), region = 44  ;;  %s1080_s13 = sshll.u32 (!%p1890_p0), %s1703_s11, 3 }
  0x77   : > { %s274_s17 = scalar_lea.sflag (!%p1890_p0), [#allocation3], %s1703_s11  ;;  %s1707_s12 = scalar_lea.vmem (!%p1890_p0), [#allocation2], %s1080_s13 }
  0x7d   : > { %1431 = dma.done.wait (%p1891_p9), %s274_s17, 128  }
  0x7e   : > { %1433 = vsyncadd (%p1891_p9), %s274_s17, 4294967168  ;;  %p1892_p11 = scmp.eq.s32.totalorder %s1528_s25, 0 }
  0x80   : > { %1435 = dma.done.wait (%p1892_p11), [#allocation6], 576   ;;  %p1893_p8 = pmov %p1892_p11 }
  0x82   : > { %1437 = vsyncadd (%p1893_p8), [#allocation6], 4294966720  ;;  %p1894_p13 = pmov %p1893_p8 }
  0x83   : > { %p1895_p6 = pmov %p1893_p8 }
  0x84   : > { %1439 = dma.done.wait (%p1894_p13), [#allocation9], 512  }
  0x85   : > { %1441 = vsyncadd (%p1895_p6), [#allocation9], 4294966784  ;;  %p321_p10 = scmp.lt.s32.totalorder %s1528_s25, 1  ;;  %v1468_v0 = vmov 0.0   ;;  %vm1469_vm0 = vmmov 0   ;;  %v328_v1 = vld [vmem:[#allocation5] sm:$0xff]  ;;  %v382_v17 = vlaneseq }
  0x86   : > { %1117 = vmatprep.subr.bf16.mxu0 %v1468_v0  ;;  %1121 = vmatprep.mubr.msk.bf16.mxu0 %vm1469_vm0, %v1468_v0  ;;  %v329_v2 = vld [vmem:[#allocation5 + $0x8] sm:$0xff]  ;;  %v330_v3 = vld [vmem:[#allocation5 + $0x10] sm:$0xff]  ;;  %v331_v5 = vld [vmem:[#allocation5 + $0x18] sm:$0xff]  ;;  %vm336_vm1 = vcmask 261120   ;;  %vm390_vm2 = vcmask 1043456   ;;  %vm386_vm3 = vcmask 64512  }
  0x87   : > { %s322_s27 = scalar_select %p321_p10, %s1528_s25, 1  ;;  %1125 = vmatprep.subr.bf16.mxu1 %v1468_v0  ;;  %1127 = vmatprep.mubr.msk.bf16.mxu1 %vm1469_vm0, %v1468_v0  ;;  %v334_v4 = vpack.c.bf16 %v329_v2, %v328_v1  ;;  %v335_v6 = vpack.c.bf16 %v331_v5, %v330_v3  ;;  %v326_v10 = vld [vmem:[%s1707_s12] sm:$0xff]  ;;  %v383_v18 = vshrl.u32 %v382_v17, 7  ;;  %v332_v20 = vld [vmem:[#allocation7] sm:$0x7]  ;;  %vm435_vm4 = vcmask 130048  }
  0x88   : > { %v1738_v16 = vpack.c.bf16 %v326_v10, %v326_v10  ;;  %s1470_s10 = smov 112   ;;  %vm483_vm5 = vcmask 261248   ;;  %s1095_s8 = sshll.u32 %s1528_s25, 4  ;;  %vm949_vm6 = vcmask 122880  }
  0x89   : > { %s1084_s29 = sshll.u32 %s322_s27, 3  ;;  %1118 = vmatpush3.bf16.msra.mxu0 %v334_v4  ;;  %v1745_v19 = vsub.s32 0, %v383_v18  ;;  %v1752_v39 = vsub.s32 1, %v383_v18  ;;  %v1754_v40 = vsub.s32 2, %v383_v18  ;;  %s320_s13 = scalar_lea.vmem [#allocation10], %s1703_s11 }
  0x8a   : > { %s324_s7 = scalar_lea.vmem %s1873_s1, %s1084_s29  ;;  %1119 = vmatprep.subr.bf16.mxu0 %v1468_v0  ;;  %v568_v1 = vsel %vm390_vm2, %v1738_v16, 0  ;;  %s964_s17 = sshll.u32 %s320_s13, 4  ;;  %s1830_s17 = int_to_ptr.vmem [resolvable:$true] %s964_s17 }
  0x8b   : > { %v327_v7 = vld [vmem:[%s324_s7] sm:$0xff]  ;;  %v385_v21 = vrot.slane %v332_v20, %v1745_v19  ;;  %v453_v41 = vrot.slane %v332_v20, %v1752_v39  ;;  %v458_v43 = vrot.slane %v332_v20, %v1754_v40  ;;  %s1828_s29 = scalar_lea.hbm %s1878_s6, %s1095_s8  ;;  %s952_s19 = scalar_lea.sflag [#allocation4], %s1703_s11 }
  0x8c   : > { %v333_v8 = vpack.c.bf16 %v327_v7, %v327_v7  ;;  %s1386_s26 = scalar_lea.vmem %s1830_s17, 16  ;;  %s1471_s25 = smov [#allocation10]  }
  0x8d   : > { %1120 = vmatpush3.bf16.msra.mxu0 %v335_v6  ;;  %p1387_p3 = scmp.ne.s32.totalorder %s1830_s17, %s1386_s26  ;;  %s1390_s7 = sshll.u32 %s1471_s25, 4  ;;  %s1391_s7 = int_to_ptr.vmem [resolvable:$false] %s1390_s7 }
  0x8e   : > { %1137 = vmatprep.subr.bf16.mxu0 %v1468_v0  ;;  %p1393_p1 = scmp.lt.s32.totalorder %s1830_s17, %s1391_s7 }
  0x8f   : > { %p1388_p7 = pnand %p1387_p3, %p1658_p5 }
  0x90   : > { %1122 = vmatmul.mubr.msk.bf16.vlgmr.msra.gmra.mrb[0].mxu0 %vm336_vm1, %v333_v8 }
  0x91   : > { %1139 = vmatprep.mubr.msk.bf16.mxu0 %vm1469_vm0, %v1468_v0  ;;  %1138 = vmatpush3.bf16.msra.mxu0 %v568_v1  ;;  %p1389_p12 = pneg %p1388_p7 }
  0x92   : > { %1149 = vmatprep.subr.bf16.mxu0 %v1468_v0 }
 0x163   : > { %v374_v9 = vpop.f32.mrb[0].mxu0 }
 0x164   : > { %v381_v11 = vpack.c.bf16 %v374_v9, %v374_v9  ;;  %v1123_v12 = vpop.f32.mrb[1].mxu0 }
 0x165   : > { %v377_v13 = vpop.f32.mrb[2].mxu0 }
 0x166   : > { %v1124_v14 = vpop.f32.mrb[3].mxu0  ;;  %v392_v15 = vsel %vm390_vm2, %v381_v11, 0 }
 0x167   : > { %1126 = vmatpush3.bf16.msra.mxu1 %v392_v15  ;;  %v659_v14 = vld [vmem:[#allocation8] sm:$0xff]  ;;  %v660_v15 = vld [vmem:[#allocation8 + $0x8] sm:$0xff] }
 0x168   : > { %1131 = vmatprep.subr.bf16.mxu1 %v1468_v0 }
 0x16a   : > { %1128 = vmatmul.mubr.msk.bf16.vlgmr.msra.gmra.mrb[0].mxu1 %vm386_vm3, %v1738_v16  ;;  %v663_v16 = vpack.c.bf16 %v660_v15, %v659_v14 }
 0x16b   : > { %1133 = vmatprep.mubr.msk.bf16.mxu1 %vm1469_vm0, %v1468_v0 }
 0x23d   : > { %v428_v22 = vpop.f32.mrb[0].mxu1 }
 0x23e   : > { %v429_v23 = vadd.f32 %v428_v22, %v385_v21  ;;  %v1129_v24 = vpop.f32.mrb[1].mxu1 }
 0x23f   : > { %v431_v25 = vpop.f32.mrb[2].mxu1 }
 0x240   : > { %v434_v26 = vmax.f32 %v429_v23, 0.0  ;;  %v1130_v27 = vpop.f32.mrb[3].mxu1 }
 0x242   : > { %461 = vrot.lane.b32.xlu0 %v434_v26, %s1470_s10  ;;  %v436_v54 = vsel %vm435_vm4, %v434_v26, 0.0 }
 0x2b4   : > { %v462_v28 = vpop.permute.xlu0 %461 }
 0x2b5   : > { %v464_v29 = vsel %vm435_vm4, %v462_v28, 0.0 }
 0x2b6   : > { %465 = vadd.xlane.f32.xlu0 %v464_v29 }
 0x343   : > { %v466_v30 = vpop.xlane.xlu0 %465 }
 0x344   : > { %v467_v31 = vmul.f32 0.0625, %v466_v30 }
 0x346   : > { %v468_v32 = vsub.f32 %v434_v26, %v467_v31 }
 0x348   : > { %v469_v33 = vmul.f32 %v468_v32, %v468_v32 }
 0x34a   : > { %471 = vrot.lane.b32.xlu1 %v469_v33, %s1470_s10 }
 0x3bc   : > { %v472_v34 = vpop.permute.xlu1 %471 }
 0x3bd   : > { %v474_v35 = vsel %vm435_vm4, %v472_v34, 0.0 }
 0x3be   : > { %475 = vadd.xlane.f32.xlu1 %v474_v35 }
 0x44b   : > { %v476_v36 = vpop.xlane.xlu1 %475 }
 0x44c   : > { %v477_v37 = vmul.f32 0.0625, %v476_v36 }
 0x44e   : > { %v478_v38 = vadd.f32 1e-05, %v477_v37 }
 0x450   : > { %1256 = vrsqrt.f32 %v478_v38  ;;  %v661_v38 = vld [vmem:[%s1877_s5] sm:$0x7] }
 0x45a   : > { %v1257_v42 = vpop.eup %1256 }
 0x45b   : > { %v480_v44 = vmul.f32 %v1257_v42, %v468_v32 }
 0x45d   : > { %v481_v45 = vmul.f32 %v480_v44, %v453_v41 }
 0x45f   : > { %v482_v46 = vadd.f32 %v481_v45, %v458_v43 }
 0x461   : > { %v484_v47 = vsel %vm483_vm5, %v482_v46, -inf }
 0x462   : > { %485 = vmax.xlane.f32.xlu0 %v484_v47 }
 0x4ef   : > { %v486_v48 = vpop.xlane.xlu0 %485 }
 0x4f0   : > { %v487_v49 = vsub.f32 %v482_v46, %v486_v48 }
 0x4f2   : > { %v488_v50 = vmul.f32 1.442695, %v487_v49 }
 0x4f4   : > { %1258 = vpow2.f32 %v488_v50 }
 0x4fe   : > { %v1259_v51 = vpop.eup %1258 }
 0x4ff   : > { %491 = vrot.lane.b32.xlu0 %v1259_v51, %s1470_s10 }
 0x571   : > { %v492_v52 = vpop.permute.xlu0 %491 }
 0x572   : > { %v494_v53 = vsel %vm435_vm4, %v492_v52, 0.0 }
 0x573   : > { %495 = vadd.xlane.f32.xlu1 %v494_v53 }
 0x577   : > { %437 = vadd.xlane.f32.xlu1 %v436_v54 }
 0x600   : > { %v496_v55 = vpop.xlane.xlu1 %495 }
 0x601   : > { %1260 = vrcp.f32 %v496_v55 }
 0x604   : > { %v438_v56 = vpop.xlane.xlu1 %437 }
 0x605   : > { %v440_v57 = vmul.f32 0.0625, %v438_v56 }
 0x607   : > { %v441_v58 = vsub.f32 %v434_v26, %v440_v57 }
 0x609   : > { %v442_v59 = vmul.f32 %v441_v58, %v441_v58 }
 0x60b   : > { %v443_v60 = vsel %vm435_vm4, %v442_v59, 0.0  ;;  %v1261_v61 = vpop.eup %1260 }
 0x60c   : > { %444 = vadd.xlane.f32.xlu1 %v443_v60  ;;  %v498_v62 = vmul.f32 %v1261_v61, %v1259_v51  ;;  %v801_v61 = vld [vmem:[#allocation8 + $0x10] sm:$0xff] }
 0x60e   : > { %v499_v63 = vpack.c.bf16 %v498_v62, %v498_v62  ;;  %v802_v62 = vld [vmem:[#allocation8 + $0x18] sm:$0xff] }
 0x61d   : > { %502 = vrot.lane.b32.xlu1 %v499_v63, %s1470_s10  ;;  %v806_v63 = vpack.c.bf16 %v802_v62, %v801_v61  ;;  %s1392_s10 = scalar_lea.vmem %s1391_s7, 32 }
 0x61e   : > { %p1394_p2 = scmp.lt.s32.totalorder %s1392_s10, %s1386_s26 }
 0x620   : > { %p1395_p4 = por %p1394_p2, %p1393_p1 }
 0x622   : > { %p1396_p0 = pnand %p1395_p4, %p1389_p12 }
 0x699   : > { %v445_v2 = vpop.xlane.xlu1 %444 }
 0x69a   : > { %v446_v3 = vmul.f32 0.0625, %v445_v2 }
 0x69c   : > { %v447_v4 = vadd.f32 1e-05, %v446_v3 }
 0x69d   : > { %v503_v5 = vpop.permute.xlu1 %502 }
 0x69e   : > { %1262 = vrsqrt.f32 %v447_v4  ;;  %505 = vxpose.xlu0.c.b16.start.end [1/1] (short) (narrow) %v503_v5, 16  ;;  %v616_v13 = vsel %vm390_vm2, %v503_v5, 0 }
 0x6a8   : > { %v1263_v6 = vpop.eup %1262 }
 0x6a9   : > { %v449_v7 = vmul.f32 %v1263_v6, %v441_v58 }
 0x6ab   : > { %v454_v8 = vmul.f32 %v453_v41, %v449_v7  ;;  %v713_v41 = vrot.slane %v661_v38, %v1745_v19  ;;  %v789_v7 = vrot.slane %v661_v38, %v1752_v39 }
 0x6ad   : > { %v459_v9 = vadd.f32 %v458_v43, %v454_v8 }
 0x6af   : > { %v500_v10 = vpack.c.bf16 %v459_v9, %v459_v9  ;;  %v795_v9 = vrot.slane %v661_v38, %v1754_v40 }
 0x6b1   : > { %v525_v11 = vsel %vm390_vm2, %v500_v10, 0 }
 0x6b2   : > { %1132 = vmatpush3.bf16.msra.mxu1 %v525_v11 }
 0x6b3   : > { %1143 = vmatprep.subr.bf16.mxu1 %v1468_v0 }
 0x704   : > { %v513_v12 = vpop.trf.xlu0 }
 0x705   : > { %1134 = vmatmul.mubr.msk.bf16.vlgmr.msra.gmra.mrb[4].mxu1 %vm386_vm3, %v513_v12  ;;  %1140 = vmatmul.mubr.msk.bf16.vlgmr.msra.gmra.mrb[4].mxu0 %vm386_vm3, %v513_v12 }
 0x706   : > { %1144 = vmatpush3.bf16.msra.mxu1 %v616_v13  ;;  %1145 = vmatprep.mubr.msk.bf16.mxu1 %vm1469_vm0, %v1468_v0 }
 0x707   : > { %1151 = vmatprep.mubr.msk.bf16.mxu0 %vm1469_vm0, %v1468_v0  ;;  %1155 = vmatprep.subr.bf16.mxu1 %v1468_v0 }
 0x708   : > { %1150 = vmatpush3.bf16.msra.mxu0 %v663_v16 }
 0x709   : > { %1161 = vmatprep.subr.bf16.mxu0 %v1468_v0 }
 0x7d8   : > { %v1777_v17 = vpop.f32.mrb[4].mxu1  ;;  %v604_v18 = vpop.f32.mrb[4].mxu0 }
 0x7d9   : > { %v1135_v20 = vpop.f32.mrb[5].mxu1  ;;  %v1141_v21 = vpop.f32.mrb[5].mxu0 }
 0x7da   : > { %v1779_v22 = vpop.f32.mrb[6].mxu1  ;;  %v607_v23 = vpop.f32.mrb[6].mxu0 }
 0x7db   : > { %v662_v24 = vpack.c.bf16 %v1779_v22, %v1777_v17  ;;  %v611_v25 = vpack.c.bf16 %v607_v23, %v604_v18  ;;  %v1136_v26 = vpop.f32.mrb[7].mxu1  ;;  %v1142_v27 = vpop.f32.mrb[7].mxu0 }
 0x7dd   : > { %1146 = vmatmul.mubr.msk.bf16.vlgmr.msra.gmra.mrb[8].mxu1 %vm386_vm3, %v611_v25  ;;  %1152 = vmatmul.mubr.msk.bf16.vlgmr.msra.gmra.mrb[8].mxu0 %vm435_vm4, %v662_v24 }
 0x7de   : > { %1157 = vmatprep.mubr.msk.bf16.mxu1 %vm1469_vm0, %v1468_v0  ;;  %1163 = vmatprep.mubr.msk.bf16.mxu0 %vm1469_vm0, %v1468_v0 }
 0x7df   : > { %1162 = vmatpush3.bf16.msra.mxu0 %v806_v63 }
 0x8b0   : > { %v652_v28 = vpop.f32.mrb[8].mxu1  ;;  %v701_v29 = vpop.f32.mrb[8].mxu0 }
 0x8b1   : > { %v1147_v30 = vpop.f32.mrb[9].mxu1  ;;  %v1153_v31 = vpop.f32.mrb[9].mxu0 }
 0x8b2   : > { %v655_v32 = vpop.f32.mrb[10].mxu1  ;;  %v704_v33 = vpop.f32.mrb[10].mxu0 }
 0x8b3   : > { %v1789_v34 = vpack.c.bf16 %v655_v32, %v652_v28  ;;  %v709_v35 = vpack.c.bf16 %v704_v33, %v701_v29  ;;  %v1148_v36 = vpop.f32.mrb[11].mxu1  ;;  %v1154_v37 = vpop.f32.mrb[11].mxu0  ;;  %v1092_v28 = vld [vmem:[%s1877_s5 + $0x4] sm:$0x7] }
 0x8b5   : > { %1156 = vmatpush3.bf16.msra.mxu1 %v709_v35 }
 0x8b6   : > { %1167 = vmatprep.subr.bf16.mxu1 %v1468_v0 }
 0x8b8   : > { %1158 = vmatmul.mubr.msk.bf16.vlgmr.msra.gmra.mrb[12].mxu1 %vm435_vm4, %v1789_v34 }
 0x8b9   : > { %1169 = vmatprep.mubr.msk.bf16.mxu1 %vm1469_vm0, %v1468_v0 }
 0x98b   : > { %v751_v42 = vpop.f32.mrb[12].mxu1 }
 0x98c   : > { %v752_v43 = vadd.f32 %v751_v42, %v713_v41  ;;  %v1159_v44 = vpop.f32.mrb[13].mxu1 }
 0x98d   : > { %v754_v45 = vpop.f32.mrb[14].mxu1 }
 0x98e   : > { %v758_v46 = vmax.f32 %v752_v43, 0.0  ;;  %v755_v47 = vadd.f32 %v754_v45, %v713_v41  ;;  %v1160_v48 = vpop.f32.mrb[15].mxu1 }
 0x990   : > { %v759_v49 = vmax.f32 %v755_v47, 0.0  ;;  %v760_v50 = vsel %vm435_vm4, %v758_v46, 0.0 }
 0x991   : > { %761 = vadd.xlane.f32.xlu1 %v760_v50 }
 0x992   : > { %v763_v51 = vsel %vm435_vm4, %v759_v49, 0.0 }
 0x993   : > { %764 = vadd.xlane.f32.xlu0 %v763_v51 }
 0xa1e   : > { %v762_v0 = vpop.xlane.xlu1 %761 }
 0xa1f   : > { %v766_v52 = vmul.f32 0.0625, %v762_v0 }
 0xa20   : > { %v765_v53 = vpop.xlane.xlu0 %764 }
 0xa21   : > { %v768_v54 = vsub.f32 %v758_v46, %v766_v52  ;;  %v767_v55 = vmul.f32 0.0625, %v765_v53 }
 0xa23   : > { %v769_v56 = vsub.f32 %v759_v49, %v767_v55  ;;  %v770_v57 = vmul.f32 %v768_v54, %v768_v54 }
 0xa25   : > { %v772_v58 = vsel %vm435_vm4, %v770_v57, 0.0  ;;  %v771_v59 = vmul.f32 %v769_v56, %v769_v56 }
 0xa26   : > { %773 = vadd.xlane.f32.xlu0 %v772_v58 }
 0xa27   : > { %v775_v60 = vsel %vm435_vm4, %v771_v59, 0.0 }
 0xa28   : > { %776 = vadd.xlane.f32.xlu1 %v775_v60 }
 0xab3   : > { %v774_v1 = vpop.xlane.xlu0 %773 }
 0xab4   : > { %v778_v2 = vmul.f32 0.0625, %v774_v1 }
 0xab5   : > { %v777_v3 = vpop.xlane.xlu1 %776 }
 0xab6   : > { %v780_v4 = vadd.f32 1e-05, %v778_v2  ;;  %v779_v5 = vmul.f32 0.0625, %v777_v3 }
 0xab8   : > { %1264 = vrsqrt.f32 %v780_v4  ;;  %v781_v6 = vadd.f32 1e-05, %v779_v5 }
 0xaba   : > { %1266 = vrsqrt.f32 %v781_v6 }
 0xac2   : > { %v1265_v8 = vpop.eup %1264 }
 0xac3   : > { %v784_v10 = vmul.f32 %v1265_v8, %v768_v54  ;;  %v928_v54 = vrot.slane %v1092_v28, %v1752_v39 }
 0xac4   : > { %v1267_v11 = vpop.eup %1266 }
 0xac5   : > { %v790_v12 = vmul.f32 %v789_v7, %v784_v10  ;;  %v785_v13 = vmul.f32 %v1267_v11, %v769_v56  ;;  %v934_v56 = vrot.slane %v1092_v28, %v1754_v40 }
 0xac7   : > { %v791_v14 = vmul.f32 %v789_v7, %v785_v13  ;;  %v796_v15 = vadd.f32 %v795_v9, %v790_v12 }
 0xac9   : > { %v797_v16 = vadd.f32 %v795_v9, %v791_v14  ;;  %v798_v18 = vadd.f32 %v796_v15, %v1777_v17  ;;  %v855_v17 = vrot.slane %v1092_v28, %v1745_v19 }
 0xacb   : > { %v799_v20 = vadd.f32 %v797_v16, %v1779_v22 }
 0xacd   : > { %v805_v21 = vpack.c.bf16 %v799_v20, %v798_v18 }
 0xacf   : > { %1164 = vmatmul.mubr.msk.bf16.vlgmr.msra.gmra.mrb[12].mxu0 %vm435_vm4, %v805_v21 }
 0xba2   : > { %v844_v23 = vpop.f32.mrb[12].mxu0 }
 0xba3   : > { %v1165_v24 = vpop.f32.mrb[13].mxu0 }
 0xba4   : > { %v847_v25 = vpop.f32.mrb[14].mxu0 }
 0xba5   : > { %v851_v26 = vpack.c.bf16 %v847_v25, %v844_v23  ;;  %v1166_v27 = vpop.f32.mrb[15].mxu0 }
 0xba7   : > { %1168 = vmatpush3.bf16.msra.mxu1 %v851_v26 }
 0xbaa   : > { %1170 = vmatmul.mubr.msk.bf16.vlgmr.msra.gmra.mrb[16].mxu1 %vm435_vm4, %v1789_v34 }
 0xc7d   : > { %v890_v29 = vpop.f32.mrb[16].mxu1 }
 0xc7e   : > { %v891_v22 = vadd.f32 %v890_v29, %v855_v17  ;;  %v1171_v30 = vpop.f32.mrb[17].mxu1 }
 0xc7f   : > { %v893_v31 = vpop.f32.mrb[18].mxu1 }
 0xc80   : > { %v897_v32 = vmax.f32 %v891_v22, 0.0  ;;  %v894_v33 = vadd.f32 %v893_v31, %v855_v17  ;;  %v1172_v35 = vpop.f32.mrb[19].mxu1 }
 0xc82   : > { %v898_v36 = vmax.f32 %v894_v33, 0.0  ;;  %v899_v37 = vsel %vm435_vm4, %v897_v32, 0.0 }
 0xc83   : > { %900 = vadd.xlane.f32.xlu0 %v899_v37 }
 0xc84   : > { %v902_v38 = vsel %vm435_vm4, %v898_v36, 0.0 }
 0xc85   : > { %903 = vadd.xlane.f32.xlu1 %v902_v38 }
 0xd10   : > { %v901_v34 = vpop.xlane.xlu0 %900 }
 0xd11   : > { %v905_v41 = vmul.f32 0.0625, %v901_v34 }
 0xd12   : > { %v904_v42 = vpop.xlane.xlu1 %903 }
 0xd13   : > { %v907_v43 = vsub.f32 %v897_v32, %v905_v41  ;;  %v906_v44 = vmul.f32 0.0625, %v904_v42 }
 0xd15   : > { %v908_v19 = vsub.f32 %v898_v36, %v906_v44  ;;  %v909_v45 = vmul.f32 %v907_v43, %v907_v43 }
 0xd17   : > { %v911_v46 = vsel %vm435_vm4, %v909_v45, 0.0  ;;  %v910_v47 = vmul.f32 %v908_v19, %v908_v19 }
 0xd18   : > { %912 = vadd.xlane.f32.xlu0 %v911_v46 }
 0xd19   : > { %v914_v48 = vsel %vm435_vm4, %v910_v47, 0.0 }
 0xd1a   : > { %915 = vadd.xlane.f32.xlu1 %v914_v48 }
 0xda5   : > { %v913_v49 = vpop.xlane.xlu0 %912 }
 0xda6   : > { %v917_v50 = vmul.f32 0.0625, %v913_v49 }
 0xda7   : > { %v916_v51 = vpop.xlane.xlu1 %915 }
 0xda8   : > { %v919_v0 = vadd.f32 1e-05, %v917_v50  ;;  %v918_v52 = vmul.f32 0.0625, %v916_v51 }
 0xdaa   : > { %1268 = vrsqrt.f32 %v919_v0  ;;  %v920_v53 = vadd.f32 1e-05, %v918_v52 }
 0xdac   : > { %1270 = vrsqrt.f32 %v920_v53 }
 0xdb4   : > { %v1269_v55 = vpop.eup %1268 }
 0xdb5   : > { %v923_v57 = vmul.f32 %v1269_v55, %v907_v43 }
 0xdb6   : > { %v1271_v58 = vpop.eup %1270 }
 0xdb7   : > { %v929_v59 = vmul.f32 %v928_v54, %v923_v57  ;;  %v924_v60 = vmul.f32 %v1271_v58, %v908_v19 }
 0xdb9   : > { %v935_v61 = vadd.f32 %v934_v56, %v929_v59  ;;  %v930_v62 = vmul.f32 %v928_v54, %v924_v60 }
 0xdbb   : > { %v937_v63 = vadd.f32 %v935_v61, %v798_v18  ;;  %v936_v1 = vadd.f32 %v934_v56, %v930_v62 }
 0xdbd   : > { %v938_v2 = vadd.f32 %v936_v1, %v799_v20  ;;  %v939_v3 = vsel %vm435_vm4, %v937_v63, 0.0 }
 0xdbf   : > { %v940_v4 = vsel %vm435_vm4, %v938_v2, 0.0 }
 0xdc0   : > { %v941_v39 = vadd.f32 %v940_v4, %v939_v3 }
 0xdc2   : > { %v942_v5 = vrot.slane %v941_v39, 4 }
 0xdc4   : > { %v943_v6 = vadd.f32 %v942_v5, %v941_v39 }
 0xdc6   : > { %v944_v40 = vrot.slane %v943_v6, 2 }
 0xdc8   : > { %v945_v7 = vadd.f32 %v944_v40, %v943_v6 }
 0xdca   : > { %v946_v8 = vrot.slane %v945_v7, 1 }
 0xdcc   : > { %v947_v9 = vadd.f32 %v946_v8, %v945_v7 }
 0xdce   : > { %v948_v10 = vmax.f32 %v947_v9, 0.0 }
 0xdd0   : > { %950 = vst.msk [vmem:[%s320_s13] sm:$0x1] %vm949_vm6, %v948_v10 }
 0xdd1   : > { %1399 = shalt.err (!%p1396_p0)
}
 0xdd2   : > { %s1400_s11 = scalar_lea.hbm %s1828_s29, 16  ;;  %s1404_s9 = scalar_lea.hbm %s1878_s6, 32 }
 0xdd3   : > { %p1401_p9 = scmp.ne.s32.totalorder %s1828_s29, %s1400_s11  ;;  %p1405_p13 = scmp.lt.u32.totalorder %s1828_s29, %s1878_s6 }
 0xdd4   : > { %p1406_p6 = scmp.lt.u32.totalorder %s1404_s9, %s1400_s11  ;;  %p1408_p3 = scmp.lt.u32.totalorder %s1400_s11, %s1828_s29 }
 0xdd5   : > { %p1402_p11 = pnand %p1401_p9, %p1658_p5 }
 0xdd6   : > { %p1407_p10 = por %p1406_p6, %p1405_p13 }
 0xdd7   : > { %p1403_p8 = pneg %p1402_p11 }
 0xdd8   : > { %p1409_p7 = por %p1408_p3, %p1407_p10 }
 0xdda   : > { %p1410_p12 = pnand %p1409_p7, %p1403_p8 }
 0xddc   : > { %1413 = shalt.err (!%p1410_p12)
}
 0xddd   : > { %1187 = dma.vmem_to_hbm [thread:$0]  (%p1658_p5), %s1830_s17, 16, %s1828_s29, %s952_s19  }
 0xdde PF: > { %s976_s13 = sand.u32 1, %s1448_s21   ;;  %p1896_p1 = scmp.ne.s32.totalorder %s1883_s28, 0 }
 0xddf   : > { %p1897_p2 = scmp.ge.s32.totalorder %s1460_s24, 2  ;;  %s977_s12 = scalar_lea.sflag [#allocation4], %s976_s13 }
 0xde1   : > { %p1204_p4 = pnand %p1897_p2, %p1896_p1 }
 0xde3   : > { %1443 = dma.done.wait (!%p1204_p4), %s977_s12, 16  }
 0xde4   : > { %1445 = vsyncadd (!%p1204_p4), %s977_s12, 4294967280  ;;  %p21_p0 = scmp.ge.s32.totalorder %s1644_s18, 4   ;;  %s1898_s21 = smov %s1452_s22 }
 0xde5   : > { %s1899_s22 = smov %s1456_s23  ;;  %s1900_s23 = smov %s1654_s14 }
 0xde6   : > { %s1901_s24 = smov %s1644_s18  ;;  %23 = sbr.rel (!%p21_p0) target bundleno = 7 (0x7), region = 106 }
 0xded   :  { %981 = vsyncpa [#allocation3], 1 }
 0xdee   :  { %983 = vsyncpa [#allocation3 + $0x1], 1 }
 0xdef   :  { %984 = vsyncpa [#allocation6], 1 }
 0xdf0   :  { %985 = vsyncpa [#allocation9], 1 }
 0xdf1   :  { %986 = vsyncpa [#allocation4], 1 }
 0xdf2   :  { %988 = vsyncpa [#allocation4 + $0x1], 1 }

</bundles_post_ra>
